<compile_context>
chip_gen: v7x
topology: tpu7x:2x2x1
jax: 0.10.0
libtpu: 0.0.40
codegen_flags: <defaults>
</compile_context>

<pallas_src>
import functools

import jax
import jax.numpy as jnp
from jax import lax
from jax.experimental import pallas as pl
from jax.experimental.pallas import tpu as pltpu


def _round_up(v, m):
    return ((v + m - 1) // m) * m


def _vmem_limit_bytes():
    """Scoped-VMEM budget derived from the actual generation.

    v5e/v6e have 128 MiB of physical VMEM per TensorCore, v7x only 64 MiB; a
    single hardcoded cap either starves v5e/v6e or overcommits v7x."""
    cap = 64 * 1024 * 1024                      # conservative fallback (v7x)
    try:
        cap = int(pltpu.get_tpu_info().vmem_capacity_bytes)
    except Exception:
        pass
    return int(min(cap * 3 // 4, 96 * 1024 * 1024))   # leave headroom


def _sepconv2d_kernel(x_ref, wf_ref, beff_ref, o_ref, stk_ref, *,
                      kernel, stride, ws, c_pad, l_tile):
    """One (batch, lane-tile) grid point.

    x_ref    : (1, 1, S*S, C_pad, WIN)  per-tile input window (lane halo included)
    wf_ref   : (NO, K*K*C_pad)          fused + stacked (pointwise x depthwise) weights
    beff_ref : (NO, 1)                  fused bias  w_pw @ b_dw + b_pw   (f32)
    o_ref    : (1, NO, L_TILE)          lane-dense output tile (L_TILE % 128 == 0)
    stk_ref  : (K*K*C_pad, L_TILE)      VMEM scratch: stacked shifted input taps
    """
    # Build the stacked contraction matrix in VMEM scratch.  Every tap is a
    # *static* lane shift read straight from the window ref (no full-window
    # values held in vregs), stored to sublane-aligned rows of the scratch.
    for rh in range(stride):
        if rh >= kernel:
            continue
        for rw in range(stride):
            if rw >= kernel:
                continue
            phase = rh * stride + rw
            n_qh = (kernel - 1 - rh) // stride + 1
            n_qw = (kernel - 1 - rw) // stride + 1
            for qh in range(n_qh):
                for qw in range(n_qw):
                    kh = qh * stride + rh
                    kw = qw * stride + rw
                    tap = kh * kernel + kw
                    off = qh * ws + qw
                    stk_ref[tap * c_pad:(tap + 1) * c_pad, :] = (
                        x_ref[0, 0, phase, :, off:off + l_tile])

    # Single MXU matmul per tile: contraction depth K*K*C_pad, f32 accumulation.
    acc = jnp.dot(wf_ref[...], stk_ref[...],
                  preferred_element_type=jnp.float32)
    # Fused bias is added once at the final store.
    o_ref[0] = (acc + beff_ref[...]).astype(o_ref.dtype)


def sep_conv2d(x, w_dw, b_dw, w_pw, b_pw, *, kernel, stride, pad,
               compute_dtype=jnp.bfloat16, target_lanes=512):
    """x: (N, C, H, W); w_dw: (C, K, K); b_dw: (C,); w_pw: (NO, C); b_pw: (NO,).

    Returns (N, NO, H_out, W_out), matching pointwise(depthwise(x))."""
    n, c, h, w = x.shape
    no = w_pw.shape[0]
    k, s = kernel, stride

    hp, wp = h + 2 * pad, w + 2 * pad
    h_out = (hp - k) // s + 1
    w_out = (wp - k) // s + 1

    # Polyphase split: stride phases become a leading dim so every tap is a unit
    # lane shift in-kernel (stride never becomes a strided lane access).
    hp_r, wp_r = _round_up(hp, s), _round_up(wp, s)
    hs, ws = hp_r // s, wp_r // s
    # TODO(synk): for large W, round ws up to a multiple of 128 so the qh*ws part
    # of each tap offset is vreg-aligned (K*K distinct lane realignments -> K).

    # Pad C to the sublane granule so slab loads / MXU contraction rows are dense.
    sub = 16 if jnp.dtype(compute_dtype) == jnp.dtype(jnp.bfloat16) else 8
    c_pad = _round_up(c, sub)

    # Lane-dense output tiling: L_TILE lanes per grid step (multiple of 128).
    lout = h_out * ws
    lout_pad = _round_up(lout, 128)
    if lout_pad > target_lanes:
        l_tile = _round_up(target_lanes, 128)
        lout_pad = _round_up(lout_pad, l_tile)
    else:
        l_tile = lout_pad
    num_tiles = lout_pad // l_tile

    # Per-tile input window = L_TILE lanes + 128-rounded halo covering all taps.
    max_off = ((k - 1) // s) * ws + (k - 1) // s
    halo = _round_up(max_off, 128) if max_off > 0 else 0
    win = l_tile + halo
    lflat = _round_up(max(hs * ws, lout_pad + halo), 128)

    # ---- single wrapper-side layout pass --------------------------------------
    # pad -> polyphase split -> flatten (H,W) on lanes -> pad C & lanes -> cast ->
    # cut overlapping per-tile windows.  XLA fuses this into O(1) copies of x.
    # TODO(synk): for stride > 1 on large inputs, fold the polyphase transpose
    # into the kernel instead (it is an extra HBM pass over x when s > 1).
    xp = jnp.pad(x, ((0, 0), (0, 0),
                     (pad, hp_r - h - pad), (pad, wp_r - w - pad)))
    xph = xp.reshape(n, c, hs, s, ws, s).transpose(0, 3, 5, 1, 2, 4)
    xph = xph.reshape(n, s * s, c, hs * ws)
    xph = jnp.pad(xph, ((0, 0), (0, 0), (0, c_pad - c), (0, lflat - hs * ws)))
    xph = xph.astype(compute_dtype)
    xwin = jnp.stack([xph[..., t * l_tile:t * l_tile + win]
                      for t in range(num_tiles)], axis=1)  # (N,T,S*S,C_pad,WIN)

    # ---- fused weights / bias --------------------------------------------------
    # wf[o, (kh*K + kw)*C_pad + cc] = w_pw[o, cc] * w_dw[cc, kh, kw]
    wf = w_pw[:, None, None, :] * jnp.transpose(w_dw, (1, 2, 0))[None]  # (NO,K,K,C)
    wf = jnp.pad(wf, ((0, 0), (0, 0), (0, 0), (0, c_pad - c)))
    wf = wf.reshape(no, k * k * c_pad).astype(compute_dtype)
    b_eff = (w_pw @ b_dw + b_pw).reshape(no, 1).astype(jnp.float32)

    kern = functools.partial(_sepconv2d_kernel, kernel=k, stride=s, ws=ws,
                             c_pad=c_pad, l_tile=l_tile)

    out_flat = pl.pallas_call(
        kern,
        out_shape=jax.ShapeDtypeStruct((n, no, lout_pad), x.dtype),
        grid_spec=pltpu.PrefetchScalarGridSpec(
            num_scalar_prefetch=0,
            # TODO(synk): for large C, add an innermost "arbitrary" C-reduction
            # grid axis with an f32 VMEM accumulator (pl.when init/finalize).
            grid=(n, num_tiles),
            in_specs=[
                # Input windows walk with (batch, lane-tile): small bounded
                # blocks, double-buffered.  (If xprof shows exposed DMA, sweep
                # pipeline_mode=pl.Buffered(3) here.)
                pl.BlockSpec((1, 1, s * s, c_pad, win),
                             lambda b, t: (b, t, 0, 0, 0)),
                # Constant index_maps -> weights/bias DMA'd once, stay resident.
                pl.BlockSpec((no, k * k * c_pad), lambda b, t: (0, 0)),
                pl.BlockSpec((no, 1), lambda b, t: (0, 0)),
            ],
            out_specs=pl.BlockSpec((1, no, l_tile), lambda b, t: (b, 0, t)),
            scratch_shapes=[pltpu.VMEM((k * k * c_pad, l_tile), compute_dtype)],
        ),
        compiler_params=pltpu.CompilerParams(
            dimension_semantics=("parallel", "parallel"),
            vmem_limit_bytes=_vmem_limit_bytes(),
        ),
    )(xwin, wf, b_eff)

    # Undo the lane-dense flattening (layout plumbing on the small output).
    out = out_flat[:, :, :h_out * ws].reshape(n, no, h_out, ws)[:, :, :, :w_out]
    return out


def sep_conv2d_ref(x, w_dw, b_dw, w_pw, b_pw, *, kernel, stride, pad):
    """Pure-JAX reference matching torch Conv2d semantics."""
    c = x.shape[1]
    no = w_pw.shape[0]
    dn = ("NCHW", "OIHW", "NCHW")
    dw = lax.conv_general_dilated(
        x, w_dw.reshape(c, 1, kernel, kernel), window_strides=(stride, stride),
        padding=[(pad, pad), (pad, pad)], dimension_numbers=dn,
        feature_group_count=c)
    dw = dw + b_dw.reshape(1, c, 1, 1)
    pw = lax.conv_general_dilated(
        dw, w_pw.reshape(no, c, 1, 1), window_strides=(1, 1),
        padding=[(0, 0), (0, 0)], dimension_numbers=dn)
    return pw + b_pw.reshape(1, no, 1, 1)


if __name__ == "__main__":
    # Module hyperparameters (ni, no, kernel, stride, pad).
    NI, NO, KERNEL, STRIDE, PAD = 4, 8, 3, 1, 1
    N, H, W = 2, 16, 16

    key = jax.random.PRNGKey(0)
    kx, k1, k2, k3, k4 = jax.random.split(key, 5)

    x = jax.random.normal(kx, (N, NI, H, W), dtype=jnp.float32)

    # Deterministic synthetic parameters (nn.Conv2d shapes with singleton dims
    # squeezed: depthwise (ni,1,K,K) -> (ni,K,K), pointwise (no,ni,1,1) -> (no,ni)).
    w_dw = 0.1 * jax.random.normal(k1, (NI, KERNEL, KERNEL), dtype=jnp.float32)
    b_dw = 0.1 * jax.random.normal(k2, (NI,), dtype=jnp.float32)
    w_pw = 0.1 * jax.random.normal(k3, (NO, NI), dtype=jnp.float32)
    b_pw = 0.1 * jax.random.normal(k4, (NO,), dtype=jnp.float32)

    ref = sep_conv2d_ref(x, w_dw, b_dw, w_pw, b_pw,
                         kernel=KERNEL, stride=STRIDE, pad=PAD)
    h_out = (H + 2 * PAD - KERNEL) // STRIDE + 1
    w_out = (W + 2 * PAD - KERNEL) // STRIDE + 1

    # f32 compute path: exact-algebra check against the conv reference.
    out_f32 = jax.block_until_ready(
        sep_conv2d(x, w_dw, b_dw, w_pw, b_pw, kernel=KERNEL, stride=STRIDE,
                   pad=PAD, compute_dtype=jnp.float32))
    assert out_f32.shape == (N, NO, h_out, w_out)
    assert jnp.allclose(out_f32, ref, atol=2e-5, rtol=2e-5)

    # Default bf16 compute path (halved HBM traffic / native MXU rate); f32
    # accumulation, so only input/weight rounding loosens the tolerance.
    out_bf16 = jax.block_until_ready(
        sep_conv2d(x, w_dw, b_dw, w_pw, b_pw,
                   kernel=KERNEL, stride=STRIDE, pad=PAD))
    assert out_bf16.shape == (N, NO, h_out, w_out)
    assert jnp.allclose(out_bf16, ref, atol=2e-2, rtol=2e-2)

    print("KERNEL_OK")
</pallas_src>

<mosaic_0001>
module attributes {stable_mosaic.version = 11 : i64} {
  func.func @_sepconv2d_kernel(%arg0: i32, %arg1: i32, %arg2: memref<1x1x1x8x512xf32, #tpu.memory_space<vmem>>, %arg3: memref<8x72xf32, #tpu.memory_space<vmem>>, %arg4: memref<8x1xf32, #tpu.memory_space<vmem>>, %arg5: memref<1x8x384xf32, #tpu.memory_space<vmem>>, %arg6: memref<72x384xf32, #tpu.memory_space<vmem>>) attributes {dimension_semantics = [#tpu.dimension_semantics<parallel>, #tpu.dimension_semantics<parallel>], iteration_bounds = array<i64: 2, 1>, scalar_prefetch = 0 : i64, scratch_operands = 1 : i64, tpu.core_type = #tpu.core_type<tc>, window_params = [{transform_indices = @transform_0, window_bounds = array<i64: 1, 1, 1, 8, 512>}, {pipeline_mode = #tpu.pipeline_mode<synchronous>, transform_indices = @transform_1, window_bounds = array<i64: 8, 72>}, {pipeline_mode = #tpu.pipeline_mode<synchronous>, transform_indices = @transform_2, window_bounds = array<i64: 8, 1>}, {transform_indices = @transform_3, window_bounds = array<i64: 1, 8, 384>}]} {
    %c0 = arith.constant 0 : index
    %c0_0 = arith.constant 0 : index
    %c0_1 = arith.constant 0 : index
    %c0_2 = arith.constant 0 : index
    %c0_3 = arith.constant 0 : index
    %0 = vector.load %arg2[%c0, %c0_0, %c0_1, %c0_2, %c0_3] : memref<1x1x1x8x512xf32, #tpu.memory_space<vmem>>, vector<1x1x1x8x384xf32>
    %1 = vector.shape_cast %0 : vector<1x1x1x8x384xf32> to vector<8x384xf32>
    %c0_4 = arith.constant 0 : index
    %c0_5 = arith.constant 0 : index
    %2 = vector.load %arg6[%c0_4, %c0_5] : memref<72x384xf32, #tpu.memory_space<vmem>>, vector<8x384xf32>
    tpu.vector_store %arg6[%c0_4, %c0_5], %1 {strides = array<i32>} : memref<72x384xf32, #tpu.memory_space<vmem>>, vector<8x384xf32>,
    %c0_6 = arith.constant 0 : index
    %c0_7 = arith.constant 0 : index
    %c0_8 = arith.constant 0 : index
    %c0_9 = arith.constant 0 : index
    %c1 = arith.constant 1 : index
    %3 = vector.load %arg2[%c0_6, %c0_7, %c0_8, %c0_9, %c1] : memref<1x1x1x8x512xf32, #tpu.memory_space<vmem>>, vector<1x1x1x8x384xf32>
    %4 = vector.shape_cast %3 : vector<1x1x1x8x384xf32> to vector<8x384xf32>
    %c8 = arith.constant 8 : index
    %c0_10 = arith.constant 0 : index
    %5 = vector.load %arg6[%c8, %c0_10] : memref<72x384xf32, #tpu.memory_space<vmem>>, vector<8x384xf32>
    tpu.vector_store %arg6[%c8, %c0_10], %4 {strides = array<i32>} : memref<72x384xf32, #tpu.memory_space<vmem>>, vector<8x384xf32>,
    %c0_11 = arith.constant 0 : index
    %c0_12 = arith.constant 0 : index
    %c0_13 = arith.constant 0 : index
    %c0_14 = arith.constant 0 : index
    %c2 = arith.constant 2 : index
    %6 = vector.load %arg2[%c0_11, %c0_12, %c0_13, %c0_14, %c2] : memref<1x1x1x8x512xf32, #tpu.memory_space<vmem>>, vector<1x1x1x8x384xf32>
    %7 = vector.shape_cast %6 : vector<1x1x1x8x384xf32> to vector<8x384xf32>
    %c16 = arith.constant 16 : index
    %c0_15 = arith.constant 0 : index
    %8 = vector.load %arg6[%c16, %c0_15] : memref<72x384xf32, #tpu.memory_space<vmem>>, vector<8x384xf32>
    tpu.vector_store %arg6[%c16, %c0_15], %7 {strides = array<i32>} : memref<72x384xf32, #tpu.memory_space<vmem>>, vector<8x384xf32>,
    %c0_16 = arith.constant 0 : index
    %c0_17 = arith.constant 0 : index
    %c0_18 = arith.constant 0 : index
    %c0_19 = arith.constant 0 : index
    %c18 = arith.constant 18 : index
    %9 = vector.load %arg2[%c0_16, %c0_17, %c0_18, %c0_19, %c18] : memref<1x1x1x8x512xf32, #tpu.memory_space<vmem>>, vector<1x1x1x8x384xf32>
    %10 = vector.shape_cast %9 : vector<1x1x1x8x384xf32> to vector<8x384xf32>
    %c24 = arith.constant 24 : index
    %c0_20 = arith.constant 0 : index
    %11 = vector.load %arg6[%c24, %c0_20] : memref<72x384xf32, #tpu.memory_space<vmem>>, vector<8x384xf32>
    tpu.vector_store %arg6[%c24, %c0_20], %10 {strides = array<i32>} : memref<72x384xf32, #tpu.memory_space<vmem>>, vector<8x384xf32>,
    %c0_21 = arith.constant 0 : index
    %c0_22 = arith.constant 0 : index
    %c0_23 = arith.constant 0 : index
    %c0_24 = arith.constant 0 : index
    %c19 = arith.constant 19 : index
    %12 = vector.load %arg2[%c0_21, %c0_22, %c0_23, %c0_24, %c19] : memref<1x1x1x8x512xf32, #tpu.memory_space<vmem>>, vector<1x1x1x8x384xf32>
    %13 = vector.shape_cast %12 : vector<1x1x1x8x384xf32> to vector<8x384xf32>
    %c32 = arith.constant 32 : index
    %c0_25 = arith.constant 0 : index
    %14 = vector.load %arg6[%c32, %c0_25] : memref<72x384xf32, #tpu.memory_space<vmem>>, vector<8x384xf32>
    tpu.vector_store %arg6[%c32, %c0_25], %13 {strides = array<i32>} : memref<72x384xf32, #tpu.memory_space<vmem>>, vector<8x384xf32>,
    %c0_26 = arith.constant 0 : index
    %c0_27 = arith.constant 0 : index
    %c0_28 = arith.constant 0 : index
    %c0_29 = arith.constant 0 : index
    %c20 = arith.constant 20 : index
    %15 = vector.load %arg2[%c0_26, %c0_27, %c0_28, %c0_29, %c20] : memref<1x1x1x8x512xf32, #tpu.memory_space<vmem>>, vector<1x1x1x8x384xf32>
    %16 = vector.shape_cast %15 : vector<1x1x1x8x384xf32> to vector<8x384xf32>
    %c40 = arith.constant 40 : index
    %c0_30 = arith.constant 0 : index
    %17 = vector.load %arg6[%c40, %c0_30] : memref<72x384xf32, #tpu.memory_space<vmem>>, vector<8x384xf32>
    tpu.vector_store %arg6[%c40, %c0_30], %16 {strides = array<i32>} : memref<72x384xf32, #tpu.memory_space<vmem>>, vector<8x384xf32>,
    %c0_31 = arith.constant 0 : index
    %c0_32 = arith.constant 0 : index
    %c0_33 = arith.constant 0 : index
    %c0_34 = arith.constant 0 : index
    %c36 = arith.constant 36 : index
    %18 = vector.load %arg2[%c0_31, %c0_32, %c0_33, %c0_34, %c36] : memref<1x1x1x8x512xf32, #tpu.memory_space<vmem>>, vector<1x1x1x8x384xf32>
    %19 = vector.shape_cast %18 : vector<1x1x1x8x384xf32> to vector<8x384xf32>
    %c48 = arith.constant 48 : index
    %c0_35 = arith.constant 0 : index
    %20 = vector.load %arg6[%c48, %c0_35] : memref<72x384xf32, #tpu.memory_space<vmem>>, vector<8x384xf32>
    tpu.vector_store %arg6[%c48, %c0_35], %19 {strides = array<i32>} : memref<72x384xf32, #tpu.memory_space<vmem>>, vector<8x384xf32>,
    %c0_36 = arith.constant 0 : index
    %c0_37 = arith.constant 0 : index
    %c0_38 = arith.constant 0 : index
    %c0_39 = arith.constant 0 : index
    %c37 = arith.constant 37 : index
    %21 = vector.load %arg2[%c0_36, %c0_37, %c0_38, %c0_39, %c37] : memref<1x1x1x8x512xf32, #tpu.memory_space<vmem>>, vector<1x1x1x8x384xf32>
    %22 = vector.shape_cast %21 : vector<1x1x1x8x384xf32> to vector<8x384xf32>
    %c56 = arith.constant 56 : index
    %c0_40 = arith.constant 0 : index
    %23 = vector.load %arg6[%c56, %c0_40] : memref<72x384xf32, #tpu.memory_space<vmem>>, vector<8x384xf32>
    tpu.vector_store %arg6[%c56, %c0_40], %22 {strides = array<i32>} : memref<72x384xf32, #tpu.memory_space<vmem>>, vector<8x384xf32>,
    %c0_41 = arith.constant 0 : index
    %c0_42 = arith.constant 0 : index
    %c0_43 = arith.constant 0 : index
    %c0_44 = arith.constant 0 : index
    %c38 = arith.constant 38 : index
    %24 = vector.load %arg2[%c0_41, %c0_42, %c0_43, %c0_44, %c38] : memref<1x1x1x8x512xf32, #tpu.memory_space<vmem>>, vector<1x1x1x8x384xf32>
    %25 = vector.shape_cast %24 : vector<1x1x1x8x384xf32> to vector<8x384xf32>
    %c64 = arith.constant 64 : index
    %c0_45 = arith.constant 0 : index
    %26 = vector.load %arg6[%c64, %c0_45] : memref<72x384xf32, #tpu.memory_space<vmem>>, vector<8x384xf32>
    tpu.vector_store %arg6[%c64, %c0_45], %25 {strides = array<i32>} : memref<72x384xf32, #tpu.memory_space<vmem>>, vector<8x384xf32>,
    %c0_46 = arith.constant 0 : index
    %c0_47 = arith.constant 0 : index
    %27 = vector.load %arg3[%c0_46, %c0_47] : memref<8x72xf32, #tpu.memory_space<vmem>>, vector<8x72xf32>
    %c0_48 = arith.constant 0 : index
    %c0_49 = arith.constant 0 : index
    %28 = vector.load %arg6[%c0_48, %c0_49] : memref<72x384xf32, #tpu.memory_space<vmem>>, vector<72x384xf32>
    %cst = arith.constant dense<0.000000e+00> : vector<8x384xf32>
    %29 = tpu.matmul %27, %28, %cst {dimension_numbers = #tpu.dot_dimension_numbers<[1], [0], [0], [1], [0, 0, 1, 1], [], []>} : vector<8x72xf32>, vector<72x384xf32>, vector<8x384xf32> -> vector<8x384xf32>
    %c0_50 = arith.constant 0 : index
    %c0_51 = arith.constant 0 : index
    %30 = vector.load %arg4[%c0_50, %c0_51] : memref<8x1xf32, #tpu.memory_space<vmem>>, vector<8x1xf32>
    %31 = vector.broadcast %30 : vector<8x1xf32> to vector<8x384xf32>
    %32 = arith.addf %29, %31 : vector<8x384xf32>
    %c0_52 = arith.constant 0 : index
    %c0_53 = arith.constant 0 : index
    %c0_54 = arith.constant 0 : index
    %33 = vector.load %arg5[%c0_52, %c0_53, %c0_54] : memref<1x8x384xf32, #tpu.memory_space<vmem>>, vector<1x8x384xf32>
    %34 = vector.shape_cast %33 : vector<1x8x384xf32> to vector<8x384xf32>
    %35 = vector.shape_cast %32 : vector<8x384xf32> to vector<1x8x384xf32>
    tpu.vector_store %arg5[%c0_52, %c0_53, %c0_54], %35 {strides = array<i32>} : memref<1x8x384xf32, #tpu.memory_space<vmem>>, vector<1x8x384xf32>,
    return
  }
  func.func @transform_0(%arg0: i32, %arg1: i32) -> (i32, i32, i32, i32, i32) {
    %c0_i32 = arith.constant 0 : i32
    %c0_i32_0 = arith.constant 0 : i32
    %c0_i32_1 = arith.constant 0 : i32
    %c0_i32_2 = arith.constant 0 : i32
    return %arg0, %arg1, %c0_i32, %c0_i32_0, %c0_i32_1 : i32, i32, i32, i32, i32
  }
  func.func @transform_1(%arg0: i32, %arg1: i32) -> (i32, i32) {
    %c0_i32 = arith.constant 0 : i32
    %c0_i32_0 = arith.constant 0 : i32
    %c0_i32_1 = arith.constant 0 : i32
    return %c0_i32, %c0_i32_0 : i32, i32
  }
  func.func @transform_2(%arg0: i32, %arg1: i32) -> (i32, i32) {
    %c0_i32 = arith.constant 0 : i32
    %c0_i32_0 = arith.constant 0 : i32
    %c0_i32_1 = arith.constant 0 : i32
    return %c0_i32, %c0_i32_0 : i32, i32
  }
  func.func @transform_3(%arg0: i32, %arg1: i32) -> (i32, i32, i32) {
    %c0_i32 = arith.constant 0 : i32
    %c0_i32_0 = arith.constant 0 : i32
    return %arg0, %c0_i32, %arg1 : i32, i32, i32
  }
}

</mosaic_0001>

<bundles_post_ra>
// kernel: tpu_custom_call.1
= control target key start
LH: loop header
LB: loop body
LE: loop exit
PB: predicated region body
PF: predicated region fallthrough
CT: control target
= control target key end

     0   :  { %8 = vsyncpa [#allocation4], 0  ;;  %s1292_s0 = inlined_call_operand.hbm [shape: f32[2,1,1,8,512], index: 0, kind: input, shape index: {}]   ;;  %s1293_s1 = inlined_call_operand.vmem [shape: f32[8,72], index: 1, kind: input, shape index: {}]   ;;  %s1294_s2 = inlined_call_operand.vmem [shape: f32[8,1], index: 2, kind: input, shape index: {}]   ;;  %s1295_s3 = inlined_call_operand.hbm [shape: f32[2,8,384], index: 3, kind: output, shape index: {}]  }
   0x1   :  { %10 = vsyncpa [#allocation4 + $0x1], 0 }
   0x2   :  { %11 = vsyncpa [#allocation5], 0 }
   0x3   :  { %13 = vsyncpa [#allocation5 + $0x1], 0  ;;  %s1072_s12 = smov 0   ;;  %s1074_s13 = smov 0  }
   0x4   :  { %s1076_s14 = smov 0   ;;  %s1078_s15 = smov 0  }
   0x5   :  { %s1080_s16 = smov 0   ;;  %s1082_s17 = smov 0  }
   0x6 LB: > { %s703_s18 = sadd.s32 4294967295, %s1036_s17   ;;  %s704_s19 = sadd.s32 4294967294, %s1036_s17   ;;  %s1036_s17 = sphi %s1082_s17, %s19_s17   ;;  %s1032_s16 = sphi %s1080_s16, %s1311_s16   ;;  %s1028_s15 = sphi %s1078_s15, %s1310_s15   ;;  %s1024_s14 = sphi %s1076_s14, %s1309_s14   ;;  %s1020_s13 = sphi %s1074_s13, %s1308_s13   ;;  %s1016_s12 = sphi %s1072_s12, %s1307_s12  }
   0x7   : > { %s31_s20 = sadd.s32 1, %s1032_s16  ;;  %s40_s21 = sadd.s32 1, %s1024_s14 }
   0x8   : > { %p33_p0 = scmp.ge.s32.totalorder %s31_s20, 2  ;;  %p47_p1 = scmp.ne.s32.totalorder %s1024_s14, %s1020_s13 }
   0x9   : > { %p48_p2 = scmp.eq.s32.totalorder %s1036_s17, 0  ;;  %p53_p3 = scmp.ne.s32.totalorder %s1020_s13, %s1016_s12 }
   0xa   : > { %s1313_s20 = smov (%p33_p0, %s31_s20), 0  ;;  %p54_p5 = scmp.eq.s32.totalorder %s703_s18, 0 }
   0xb   : > { %p1113_p4 = por %p48_p2, %p47_p1  ;;  %s35_s23 = ssub.s32 %s1032_s16, %s1313_s20 }
   0xc   : > { %p121_p6 = scmp.eq.s32.totalorder %s703_s18, 1  ;;  %p38_p7 = scmp.eq.s32.totalorder %s35_s23, 0 }
   0xd   : > { %p1119_p8 = por %p54_p5, %p53_p3  ;;  %p127_p10 = scmp.eq.s32.totalorder %s704_s19, 1 }
   0xe   : > { %p1123_p9 = por %p121_p6, %p47_p1  ;;  %p791_p13 = scmp.lt.s32.totalorder %s1036_s17, 2 }
   0xf   : > { %s1128_s26 = scalar_select %p38_p7, %s1024_s14, %s40_s21  }
  0x10   : > { %s1299_s25 = scalar_select %p1123_p9, 1, 0 }
  0x11   : > { %p1130_p11 = por %p127_p10, %p53_p3  ;;  %s153_s28 = sand.u32 1, %s1024_s14  }
  0x12   : > { %s707_s29 = sshll.u32 %s153_s28, 5  ;;  %s717_s30 = sshll.u32 %s1032_s16, 9 }
  0x13   : > { %s1300_s27 = scalar_select %p1130_p11, 1, 0 }
  0x14   : > { %s1141_s6 = scalar_lea.hbm %s1292_s0, %s717_s30  ;;  %s157_s7 = scalar_lea.vmem [#allocation3], %s707_s29 }
  0x15   : > { %s167_s8 = sshll.u32 %s157_s7, 4  ;;  %p1147_p0 = pnand %p791_p13, %p1113_p4  ;;  %s1143_s8 = int_to_ptr.vmem [resolvable:$true] %s167_s8 }
  0x16   : > { %s154_s10 = scalar_lea.sflag [#allocation4], %s153_s28  ;;  %s924_s11 = scalar_lea.hbm %s1141_s6, 512 }
  0x17   : > { %p925_p3 = scmp.ne.s32.totalorder %s1141_s6, %s924_s11  ;;  %p926_p5 = pneg %p1147_p0 }
  0x18   : > { %s929_s21 = scalar_lea.hbm %s1292_s0, 1024  ;;  %p930_p4 = scmp.lt.u32.totalorder %s1141_s6, %s1292_s0 }
  0x19   : > { %p927_p6 = pnand %p926_p5, %p925_p3  ;;  %p931_p10 = scmp.lt.u32.totalorder %s929_s21, %s924_s11 }
  0x1a   : > { %p933_p12 = scmp.lt.u32.totalorder %s924_s11, %s1141_s6 }
  0x1b   : > { %p928_p7 = pneg %p927_p6  ;;  %p932_p13 = por %p931_p10, %p930_p4 }
  0x1d   : > { %p934_p1 = por %p933_p12, %p932_p13 }
  0x1f   : > { %p935_p2 = pnand %p934_p1, %p928_p7 }
  0x21   : > { %938 = shalt.err (!%p935_p2)
}
  0x22   : > { %s939_s28 = scalar_lea.vmem %s1143_s8, 512  ;;  %s1038_s29 = smov [#allocation3]  }
  0x23   : > { %p940_p3 = scmp.ne.s32.totalorder %s1143_s8, %s939_s28  ;;  %s944_s30 = sshll.u32 %s1038_s29, 4  ;;  %s945_s30 = int_to_ptr.vmem [resolvable:$false] %s944_s30 }
  0x24   : > { %s946_s4 = scalar_lea.vmem %s945_s30, 1024  ;;  %p947_p9 = scmp.lt.s32.totalorder %s1143_s8, %s945_s30 }
  0x25   : > { %p942_p6 = pnand %p940_p3, %p926_p5  ;;  %p948_p4 = scmp.lt.s32.totalorder %s946_s4, %s939_s28 }
  0x27   : > { %p943_p11 = pneg %p942_p6  ;;  %p949_p10 = por %p948_p4, %p947_p9 }
  0x29   : > { %p950_p12 = pnand %p949_p10, %p943_p11 }
  0x2b   : > { %953 = shalt.err (!%p950_p12)
}
  0x2c   : > { %786 = dma.hbm_to_vmem [thread:$0]  (!%p1147_p0), %s1141_s6, 512, %s1143_s8, %s154_s10  }
  0x2d   : > { %p1302_p1 = scmp.lt.s32.totalorder %s1036_s17, 3  ;;  %p1303_p2 = scmp.ge.s32.totalorder %s1036_s17, 1 }
  0x2f   : > { %p173_p5 = pnand %p1303_p2, %p1302_p1 }
  0x30   : > { %s1183_s5 = sand.u32 (!%p173_p5), 1, %s1020_s13  }
  0x31   : > { %176 = sbr.rel (%p173_p5) target bundleno = 438 (0x1b6), region = 32  ;;  %s711_s7 = sshll.u32 (!%p173_p5), %s1183_s5, 5 }
  0x32   : > { %s179_s11 = scalar_lea.sflag (!%p173_p5), [#allocation4], %s1183_s5  ;;  %s182_s18 = scalar_lea.vmem (!%p173_p5), [#allocation3], %s711_s7 }
  0x38   : > { %1007 = dma.done.wait (%p1119_p8), %s179_s11, 512  }
  0x39   : > { %1009 = vsyncadd (%p1119_p8), %s179_s11, 4294966784  ;;  %v1039_v0 = vmov 0.0|0.0   ;;  %v239_v1 = vld [vmem:[%s182_s18 + $0x8] sm:$0xff]  ;;  %v1192_v2 = vld [vmem:[%s182_s18 + $0x10] sm:$0xff]  ;;  %s1040_s6 = smov 126   ;;  %s1041_s8 = smov 127  }
  0x3a   : > { %765 = vmatprep.subr.bf16.mxu1 %v1039_v0  ;;  %v1194_v3 = vld [vmem:[%s182_s18] sm:$0xff]  ;;  %v863_v4 = vpack.i.bf16 %v1192_v2, %v239_v1  ;;  %v215_v5 = vld [vmem:[%s182_s18 + $0x18] sm:$0xff]  ;;  %s1042_s9 = smov 110   ;;  %s1043_s24 = smov 108   ;;  %v1045_v7 = vmov 0.0   ;;  %vm1048_vm0 = vmmov 0  }
  0x3b   : > { %v858_v6 = vpack.i.bf16 %v215_v5, %v1194_v3  ;;  %s1044_s10 = smov 109   ;;  %522 = vmatprep.mubr.f32.mxu0 %v1045_v7  ;;  %s1046_s19 = smov 91   ;;  %746 = vmatprep.mubr.msk.f32.mxu1 %vm1048_vm0, %v1045_v7  ;;  %v1049_v8 = vmov 0   ;;  %v448_v9 = vld [vmem:[%s1294_s2] sm:$0xff]  ;;  %vm228_vm1 = vcmask 1039360   ;;  %vm254_vm2 = vcmask 1031168  }
  0x3c   : > { %864 = vrot.lane.b32.xlu1 %v863_v4, %s1040_s6  ;;  %854 = vrot.lane.b32.xlu0 %v863_v4, %s1041_s8  ;;  %s1047_s21 = smov 92   ;;  %s1050_s22 = smov 90   ;;  %vm280_vm3 = vcmask 900096   ;;  %vm306_vm4 = vcmask 891904   ;;  %vm332_vm5 = vcmask 883712   ;;  %vm358_vm6 = vcmask 752640  }
  0x3d   : > { %923 = vset.pattern.permute.xlu0 %v1049_v8  ;;  %vm384_vm7 = vcmask 744448   ;;  %vm410_vm8 = vcmask 736256   ;;  %vm454_vm9 = vcmask 588800   ;;  %s777_s4 = smul.u32 24, %s1183_s5  ;;  %p1304_p9 = scmp.ne.s32.totalorder %s1299_s25, 0 }
  0x3e   : > { %s778_s7 = smul.u32 384, %s1028_s15  ;;  %s603_s15 = scalar_lea.sflag [#allocation5], %s1183_s5 }
  0x3f   : > { %s204_s11 = scalar_lea.vmem [#allocation6], %s777_s4 }
  0x40   : > { %869 = vrot.lane.b32.xlu1 %v863_v4, %s1042_s9  ;;  %859 = vrot.lane.b32.xlu0 %v858_v6, %s1041_s8  ;;  %s619_s18 = sshll.u32 %s204_s11, 4  ;;  %s1245_s18 = int_to_ptr.vmem [resolvable:$true] %s619_s18 }
  0x44   : > { %879 = vrot.lane.b32.xlu1 %v858_v6, %s1042_s9  ;;  %874 = vrot.lane.b32.xlu0 %v858_v6, %s1040_s6  ;;  %s1243_s9 = scalar_lea.hbm %s1295_s3, %s778_s7 }
  0x48   : > { %889 = vrot.lane.b32.xlu1 %v863_v4, %s1043_s24  ;;  %884 = vrot.lane.b32.xlu0 %v863_v4, %s1044_s10 }
  0x4c   : > { %899 = vrot.lane.b32.xlu1 %v858_v6, %s1043_s24  ;;  %894 = vrot.lane.b32.xlu0 %v858_v6, %s1044_s10  ;;  %s954_s24 = scalar_lea.vmem %s1245_s18, 384  ;;  %s1051_s10 = smov [#allocation6]  }
  0x4d   : > { %p955_p8 = scmp.ne.s32.totalorder %s1245_s18, %s954_s24 }
  0x4f   : > { %p956_p11 = pnand %p955_p8, %p1304_p9 }
  0x50   : > { %909 = vrot.lane.b32.xlu1 %v863_v4, %s1046_s19  ;;  %904 = vrot.lane.b32.xlu0 %v863_v4, %s1047_s21 }
  0x51   : > { %p957_p0 = pneg %p956_p11 }
  0x54   : > { %919 = vrot.lane.b32.xlu1 %v858_v6, %s1046_s19  ;;  %914 = vrot.lane.b32.xlu0 %v858_v6, %s1047_s21  ;;  %s958_s19 = sshll.u32 %s1051_s10, 4  ;;  %s959_s19 = int_to_ptr.vmem [resolvable:$false] %s958_s19 }
  0x55   : > { %s960_s21 = scalar_lea.vmem %s959_s19, 768  ;;  %p961_p7 = scmp.lt.s32.totalorder %s1245_s18, %s959_s19 }
  0x56   : > { %p962_p13 = scmp.lt.s32.totalorder %s960_s21, %s954_s24 }
  0x58   : > { %406 = vrot.lane.b32.xlu1 %v1192_v2, %s1050_s22  ;;  %404 = vrot.lane.b32.xlu0 %v239_v1, %s1050_s22  ;;  %p963_p3 = por %p962_p13, %p961_p7 }
  0x5a   : > { %p964_p6 = pnand %p963_p3, %p957_p0 }
  0x5c   : > { %408 = vrot.lane.b32.xlu1 %v215_v5, %s1050_s22  ;;  %402 = vrot.lane.b32.xlu0 %v1194_v3, %s1050_s22 }
  0x60   : > { %451 = vperm.xlu0 %923, %v448_v9  }
  0xae   : > { %v865_v10 = vpop.permute.xlu1 %864  ;;  %v855_v11 = vpop.permute.xlu0 %854 }
  0xaf   : > { %v857_v12 = vunpack.i.h.bf16 %v855_v11  ;;  %v856_v13 = vunpack.i.l.bf16 %v855_v11  ;;  %v867_v14 = vunpack.i.h.bf16 %v865_v10  ;;  %v866_v15 = vunpack.i.l.bf16 %v865_v10 }
  0xb1   : > { %v230_v16 = vsel %vm228_vm1, %v856_v13, %v857_v12  ;;  %v256_v26 = vsel %vm254_vm2, %v866_v15, %v867_v14 }
  0xb2   : > { %v870_v17 = vpop.permute.xlu1 %869  ;;  %v860_v18 = vpop.permute.xlu0 %859  ;;  %v749_v19 = vpack.c.bf16 %v230_v16, %v239_v1 }
  0xb3   : > { %v872_v20 = vunpack.i.h.bf16 %v870_v17  ;;  %v871_v21 = vunpack.i.l.bf16 %v870_v17  ;;  %v862_v22 = vunpack.i.h.bf16 %v860_v18  ;;  %v861_v23 = vunpack.i.l.bf16 %v860_v18 }
  0xb4   : > { %750 = vmatprep.subr.bf16.mxu0 %v749_v19 }
  0xb5   : > { %v229_v24 = vsel %vm228_vm1, %v861_v23, %v856_v13  ;;  %v231_v25 = vsel %vm228_vm1, %v857_v12, %v862_v22  ;;  %v282_v27 = vsel %vm280_vm3, %v871_v21, %v872_v20 }
  0xb6   : > { %v880_v28 = vpop.permute.xlu1 %879  ;;  %v875_v29 = vpop.permute.xlu0 %874  ;;  %v751_v30 = vpack.c.bf16 %v229_v24, %v1194_v3  ;;  %v766_v31 = vpack.c.bf16 %v231_v25, %v1192_v2  ;;  %v753_v32 = vpack.c.bf16 %v282_v27, %v256_v26  ;;  %v420_v27 = vld [vmem:[%s1293_s1] sm:$0xff] }
  0xb7   : > { %v882_v33 = vunpack.i.h.bf16 %v880_v28  ;;  %v881_v34 = vunpack.i.l.bf16 %v880_v28  ;;  %v877_v35 = vunpack.i.h.bf16 %v875_v29  ;;  %v876_v36 = vunpack.i.l.bf16 %v875_v29 }
  0xb8   : > { %752 = vmatpush1.bf16.msra.mxu0 %v751_v30  ;;  %767 = vmatpush3.bf16.msra.mxu1 %v766_v31 }
  0xb9   : > { %754 = vmatprep.subr.bf16.mxu0 %v753_v32  ;;  %768 = vmatprep.subr.bf16.mxu1 %v1039_v0  ;;  %v255_v37 = vsel %vm254_vm2, %v876_v36, %v866_v15  ;;  %v281_v38 = vsel %vm280_vm3, %v881_v34, %v871_v21  ;;  %v257_v39 = vsel %vm254_vm2, %v867_v14, %v877_v35 }
  0xba   : > { %v890_v40 = vpop.permute.xlu1 %889  ;;  %v885_v41 = vpop.permute.xlu0 %884  ;;  %v755_v42 = vpack.c.bf16 %v281_v38, %v255_v37  ;;  %v283_v43 = vsel %vm280_vm3, %v872_v20, %v882_v33 }
  0xbb   : > { %v892_v44 = vunpack.i.h.bf16 %v890_v40  ;;  %v891_v45 = vunpack.i.l.bf16 %v890_v40  ;;  %v887_v46 = vunpack.i.h.bf16 %v885_v41  ;;  %v886_v47 = vunpack.i.l.bf16 %v885_v41 }
  0xbc   : > { %756 = vmatpush1.bf16.msra.mxu0 %v755_v42  ;;  %v769_v48 = vpack.c.bf16 %v283_v43, %v257_v39 }
  0xbd   : > { %v308_v49 = vsel %vm306_vm4, %v886_v47, %v887_v46  ;;  %v334_v50 = vsel %vm332_vm5, %v891_v45, %v892_v44 }
  0xbe   : > { %770 = vmatpush3.bf16.msra.mxu1 %v769_v48  ;;  %v900_v51 = vpop.permute.xlu1 %899  ;;  %v895_v52 = vpop.permute.xlu0 %894  ;;  %v757_v53 = vpack.c.bf16 %v334_v50, %v308_v49 }
  0xbf   : > { %v902_v54 = vunpack.i.h.bf16 %v900_v51  ;;  %v901_v55 = vunpack.i.l.bf16 %v900_v51  ;;  %v897_v56 = vunpack.i.h.bf16 %v895_v52  ;;  %v896_v57 = vunpack.i.l.bf16 %v895_v52  ;;  %771 = vmatprep.subr.bf16.mxu1 %v1039_v0 }
  0xc0   : > { %758 = vmatprep.subr.bf16.mxu0 %v757_v53 }
  0xc1   : > { %v307_v58 = vsel %vm306_vm4, %v896_v57, %v886_v47  ;;  %v333_v59 = vsel %vm332_vm5, %v901_v55, %v891_v45  ;;  %v309_v60 = vsel %vm306_vm4, %v887_v46, %v897_v56  ;;  %v335_v61 = vsel %vm332_vm5, %v892_v44, %v902_v54 }
  0xc2   : > { %v910_v62 = vpop.permute.xlu1 %909  ;;  %v905_v63 = vpop.permute.xlu0 %904  ;;  %v759_v1 = vpack.c.bf16 %v333_v59, %v307_v58  ;;  %v772_v2 = vpack.c.bf16 %v335_v61, %v309_v60 }
  0xc3   : > { %v912_v3 = vunpack.i.h.bf16 %v910_v62  ;;  %v911_v4 = vunpack.i.l.bf16 %v910_v62  ;;  %v907_v5 = vunpack.i.h.bf16 %v905_v63  ;;  %v906_v6 = vunpack.i.l.bf16 %v905_v63 }
  0xc4   : > { %760 = vmatpush1.bf16.msra.mxu0 %v759_v1  ;;  %773 = vmatpush3.bf16.msra.mxu1 %v772_v2 }
  0xc5   : > { %v360_v8 = vsel %vm358_vm6, %v906_v6, %v907_v5  ;;  %v386_v9 = vsel %vm384_vm7, %v911_v4, %v912_v3  ;;  %774 = vmatprep.subr.bf16.mxu1 %v1039_v0 }
  0xc6   : > { %v920_v10 = vpop.permute.xlu1 %919  ;;  %v915_v11 = vpop.permute.xlu0 %914  ;;  %v761_v12 = vpack.c.bf16 %v386_v9, %v360_v8 }
  0xc7   : > { %v922_v13 = vunpack.i.h.bf16 %v920_v10  ;;  %v921_v14 = vunpack.i.l.bf16 %v920_v10  ;;  %v917_v15 = vunpack.i.h.bf16 %v915_v11  ;;  %v916_v16 = vunpack.i.l.bf16 %v915_v11 }
  0xc8   : > { %762 = vmatprep.subr.bf16.mxu0 %v761_v12 }
  0xc9   : > { %v359_v17 = vsel %vm358_vm6, %v916_v16, %v906_v6  ;;  %v385_v18 = vsel %vm384_vm7, %v921_v14, %v911_v4  ;;  %v361_v19 = vsel %vm358_vm6, %v907_v5, %v917_v15  ;;  %v387_v20 = vsel %vm384_vm7, %v912_v3, %v922_v13 }
  0xca   : > { %v407_v21 = vpop.permute.xlu1 %406  ;;  %v405_v22 = vpop.permute.xlu0 %404  ;;  %v763_v0 = vpack.c.bf16 %v385_v18, %v359_v17  ;;  %v775_v23 = vpack.c.bf16 %v387_v20, %v361_v19 }
  0xcb   : > { %v412_v24 = vsel %vm410_vm8, %v405_v22, %v407_v21 }
  0xcc   : > { %764 = vmatpush1.bf16.msra.mxu0 %v763_v0  ;;  %776 = vmatpush3.bf16.msra.mxu1 %v775_v23 }
  0xcd   : > { %474 = vmatprep.subr.mxu0 %v412_v24  ;;  %744 = vmatprep.subr.mxu1 %v1045_v7 }
  0xce   : > { %v409_v25 = vpop.permute.xlu1 %408  ;;  %v403_v26 = vpop.permute.xlu0 %402 }
  0xcf   : > { %v411_v28 = vsel %vm410_vm8, %v403_v26, %v405_v22  ;;  %v413_v29 = vsel %vm410_vm8, %v407_v21, %v409_v25 }
  0xd0   : > { %475 = vmatpush1.msra.mxu0 %v411_v28  ;;  %745 = vmatpush3.msra.mxu1 %v413_v29 }
  0xd1   : > { %712 = vmatmul.mubr.msk.f32.vlgmr.msra.gmra.mrb[0].mxu0 %vm454_vm9, %v420_v27  ;;  %747 = vmatmul.mubr.msk.f32.vlgmr.msra.gmra.mrb[0].mxu1 %vm454_vm9, %v420_v27 }
  0xdf   : > { %v452_v30 = vpop.permute.xlu0 %451 }
 0x1a4   : > { %v524_v7 = vpop.f32.mrb[0].mxu0  ;;  %v595_v31 = vpop.f32.mrb[0].mxu1 }
 0x1a5   : > { %v525_v32 = vadd.f32 %v524_v7, %v452_v30  ;;  %v596_v33 = vadd.f32 %v595_v31, %v452_v30  ;;  %v526_v34 = vpop.f32.mrb[1].mxu0  ;;  %v748_v35 = vpop.f32.mrb[1].mxu1 }
 0x1a6   : > { %v527_v36 = vadd.f32 %v526_v34, %v452_v30 }
 0x1a7   : > { %599 = vst [vmem:[%s204_s11] sm:$0xff] %v525_v32  ;;  %601 = vst [vmem:[%s204_s11 + $0x10] sm:$0xff] %v596_v33 }
 0x1a8   : > { %600 = vst [vmem:[%s204_s11 + $0x8] sm:$0xff] %v527_v36 }
 0x1a9   : > { %967 = shalt.err (!%p964_p6)
}
 0x1aa   : > { %s968_s5 = scalar_lea.hbm %s1243_s9, 384  ;;  %s972_s28 = scalar_lea.hbm %s1295_s3, 768 }
 0x1ab   : > { %p969_p4 = scmp.ne.s32.totalorder %s1243_s9, %s968_s5  ;;  %p973_p1 = scmp.lt.u32.totalorder %s1243_s9, %s1295_s3 }
 0x1ac   : > { %p974_p2 = scmp.lt.u32.totalorder %s972_s28, %s968_s5  ;;  %p976_p8 = scmp.lt.u32.totalorder %s968_s5, %s1243_s9 }
 0x1ad   : > { %p970_p10 = pnand %p969_p4, %p1304_p9 }
 0x1ae   : > { %p975_p5 = por %p974_p2, %p973_p1 }
 0x1af   : > { %p971_p12 = pneg %p970_p10 }
 0x1b0   : > { %p977_p11 = por %p976_p8, %p975_p5 }
 0x1b2   : > { %p978_p0 = pnand %p977_p11, %p971_p12 }
 0x1b4   : > { %981 = shalt.err (!%p978_p0)
}
 0x1b5   : > { %781 = dma.vmem_to_hbm [thread:$0]  (%p1304_p9), %s1245_s18, 384, %s1243_s9, %s603_s15  }
 0x1b6 PF: > { %s631_s4 = sand.u32 1, %s1016_s12   ;;  %p1305_p7 = scmp.ne.s32.totalorder %s1300_s27, 0 }
 0x1b7   : > { %p1306_p13 = scmp.ge.s32.totalorder %s1036_s17, 2  ;;  %s632_s7 = scalar_lea.sflag [#allocation5], %s631_s4 }
 0x1b9   : > { %p788_p3 = pnand %p1306_p13, %p1305_p7 }
 0x1bb   : > { %1011 = dma.done.wait (!%p788_p3), %s632_s7, 384  }
 0x1bc   : > { %1013 = vsyncadd (!%p788_p3), %s632_s7, 4294966912  ;;  %s19_s17 = sadd.s32 1, %s1036_s17   ;;  %s1307_s12 = smov %s1020_s13 }
 0x1bd   : > { %p16_p6 = scmp.ge.s32.totalorder %s19_s17, 4   ;;  %s1308_s13 = smov %s1024_s14 }
 0x1be   : > { %s1309_s14 = smov %s1128_s26  ;;  %s1310_s15 = smov %s1032_s16 }
 0x1bf   : > { %s1311_s16 = smov %s1313_s20  ;;  %18 = sbr.rel (!%p16_p6) target bundleno = 6 (0x6), region = 77 }
 0x1c6   :  { %637 = vsyncpa [#allocation4], 1 }
 0x1c7   :  { %639 = vsyncpa [#allocation4 + $0x1], 1 }
 0x1c8   :  { %640 = vsyncpa [#allocation5], 1 }
 0x1c9   :  { %642 = vsyncpa [#allocation5 + $0x1], 1 }

</bundles_post_ra>
